<compile_context>
chip_gen: v7x
topology: tpu7x:2x2x1
jax: 0.10.0
libtpu: 0.0.40
codegen_flags: <defaults>
</compile_context>

<pallas_src>
import jax
import jax.numpy as jnp
from jax.experimental import pallas as pl
from jax.experimental.pallas import tpu as pltpu


def _round_up(x, m):
    return ((x + m - 1) // m) * m


def hsg_kernel(sl_ref, sp_ref, w_ref, b_ref, out_ref):
    s_l = sl_ref[...]          # (Bp, Np)  s_l_t            (zero-padded)
    s_p = sp_ref[...]          # (Bp, Np)  s_prime_tm1      (zero-padded)

    # Single fused MXU matmul over the concatenated contraction axis.
    x_cat = jnp.concatenate([s_p, s_l], axis=-1)           # (Bp, 2*Np)
    pre = jnp.dot(x_cat, w_ref[...],
                  preferred_element_type=jnp.float32) + b_ref[...]  # (Bp, Np)

    g = jax.nn.sigmoid(pre)                                # EUP

    # out = g*s_p + (1-g)*s_l  ==  s_l + g*(s_p - s_l)   (fewer VPU ops)
    s_l32 = s_l.astype(jnp.float32)
    out = s_l32 + g * (s_p.astype(jnp.float32) - s_l32)
    out_ref[...] = out.astype(out_ref.dtype)


def prepare_hsg_params(w_r, w_f, b_f, n_pad):
    """One-time parameter prep (outside any per-timestep path).

    w_r, w_f: (N, N) in PyTorch (out, in) layout.  b_f: (N,).
    Returns W_cat of shape (2*n_pad, n_pad) laid out so that
        [s_prime | s_l] @ W_cat == s_prime @ W_R^T + s_l @ W_F^T
    and a (1, n_pad) padded bias.
    """
    n = w_r.shape[0]
    dt = w_r.dtype
    w_cat = jnp.zeros((2 * n_pad, n_pad), dt)
    w_cat = w_cat.at[:n, :n].set(w_r.T)                    # rows for s_prime
    w_cat = w_cat.at[n_pad:n_pad + n, :n].set(w_f.T)       # rows for s_l
    b_pad = jnp.zeros((1, n_pad), b_f.dtype).at[0, :n].set(b_f)
    return w_cat, b_pad


def hsg_step(s_l_pad, s_p_pad, w_cat, b_pad):
    """Per-step call: padded, lane-dense, single fused matmul."""
    bp, np_ = s_l_pad.shape

    def full(shape):
        return pl.BlockSpec(shape, lambda: (0,) * len(shape))

    return pl.pallas_call(
        hsg_kernel,
        out_shape=jax.ShapeDtypeStruct((bp, np_), s_p_pad.dtype),
        grid_spec=pltpu.PrefetchScalarGridSpec(
            num_scalar_prefetch=0,
            grid=(),
            in_specs=[
                full((bp, np_)),         # s_l_t
                full((bp, np_)),         # s_prime_tm1
                full((2 * np_, np_)),    # W_cat
                full((1, np_)),          # b_F
            ],
            out_specs=full((bp, np_)),
        ),
        # Reuse the s_prime_tm1 buffer for s_prime_t (in-place state update).
        input_output_aliases={1: 0},
    )(s_l_pad, s_p_pad, w_cat, b_pad)


@jax.jit
def hsg_layer(s_l_t, s_prime_tm1, w_r, w_f, b_f):
    """Matches HSGLayer.forward. s_l_t, s_prime_tm1: (B, N).
    w_r, w_f: (N, N) PyTorch (out, in) layout. b_f: (N,)."""
    b, n = s_l_t.shape
    bp = _round_up(b, 8)
    np_ = _round_up(max(n, 128), 128)   # lane-dense activations / output

    w_cat, b_pad = prepare_hsg_params(w_r, w_f, b_f, np_)

    s_l_pad = jnp.zeros((bp, np_), s_l_t.dtype).at[:b, :n].set(s_l_t)
    s_p_pad = jnp.zeros((bp, np_), s_prime_tm1.dtype).at[:b, :n].set(s_prime_tm1)

    out = hsg_step(s_l_pad, s_p_pad, w_cat, b_pad)
    return out[:b, :n]


def reference(s_l_t, s_prime_tm1, w_r, w_f, b_f):
    g = jax.nn.sigmoid(s_prime_tm1 @ w_r.T + s_l_t @ w_f.T + b_f)
    return g * s_prime_tm1 + (1.0 - g) * s_l_t


if __name__ == "__main__":
    batch, n_units = 8, 32
    init_gates_closed = True

    key = jax.random.PRNGKey(0)
    k1, k2, k3, k4, k5 = jax.random.split(key, 5)

    # Deterministic synthetic parameters (shapes match torch.nn.Linear(n, n)).
    bound = 1.0 / jnp.sqrt(n_units)
    w_r = jax.random.uniform(k1, (n_units, n_units), jnp.float32, -bound, bound)
    w_f = jax.random.uniform(k2, (n_units, n_units), jnp.float32, -bound, bound)
    if init_gates_closed:
        b_f = jnp.full((n_units,), -2.5, jnp.float32)
    else:
        b_f = jax.random.uniform(k3, (n_units,), jnp.float32, -bound, bound)

    s_l_t = jax.random.normal(k4, (batch, n_units), jnp.float32)
    s_prime_tm1 = jax.random.normal(k5, (batch, n_units), jnp.float32)

    out = hsg_layer(s_l_t, s_prime_tm1, w_r, w_f, b_f)
    jax.block_until_ready(out)

    ref = reference(s_l_t, s_prime_tm1, w_r, w_f, b_f)
    assert jnp.allclose(out, ref, atol=1e-5, rtol=1e-5), "mismatch vs reference"

    print("KERNEL_OK")
</pallas_src>

<mosaic_0001>
module attributes {stable_mosaic.version = 11 : i64} {
  func.func @hsg_kernel(%arg0: memref<8x128xf32, #tpu.memory_space<vmem>>, %arg1: memref<8x128xf32, #tpu.memory_space<vmem>>, %arg2: memref<256x128xf32, #tpu.memory_space<vmem>>, %arg3: memref<1x128xf32, #tpu.memory_space<vmem>>, %arg4: memref<8x128xf32, #tpu.memory_space<vmem>>) attributes {dimension_semantics = [], scalar_prefetch = 0 : i64, scratch_operands = 0 : i64, tpu.core_type = #tpu.core_type<tc>} {
    %c0 = arith.constant 0 : index
    %c0_0 = arith.constant 0 : index
    %0 = vector.load %arg0[%c0, %c0_0] : memref<8x128xf32, #tpu.memory_space<vmem>>, vector<8x128xf32>
    %c0_1 = arith.constant 0 : index
    %c0_2 = arith.constant 0 : index
    %1 = vector.load %arg1[%c0_1, %c0_2] : memref<8x128xf32, #tpu.memory_space<vmem>>, vector<8x128xf32>
    %2 = tpu.concatenate %1, %0 in 1 : vector<8x128xf32>, vector<8x128xf32> -> vector<8x256xf32>
    %c0_3 = arith.constant 0 : index
    %c0_4 = arith.constant 0 : index
    %3 = vector.load %arg2[%c0_3, %c0_4] : memref<256x128xf32, #tpu.memory_space<vmem>>, vector<256x128xf32>
    %cst = arith.constant dense<0.000000e+00> : vector<8x128xf32>
    %4 = tpu.matmul %2, %3, %cst {dimension_numbers = #tpu.dot_dimension_numbers<[1], [0], [0], [1], [0, 0, 1, 1], [], []>} : vector<8x256xf32>, vector<256x128xf32>, vector<8x128xf32> -> vector<8x128xf32>
    %c0_5 = arith.constant 0 : index
    %c0_6 = arith.constant 0 : index
    %5 = vector.load %arg3[%c0_5, %c0_6] : memref<1x128xf32, #tpu.memory_space<vmem>>, vector<1x128xf32>
    %6 = vector.broadcast %5 : vector<1x128xf32> to vector<8x128xf32>
    %7 = arith.addf %4, %6 : vector<8x128xf32>
    %8 = arith.negf %7 : vector<8x128xf32>
    %9 = math.exp %8 : vector<8x128xf32>
    %cst_7 = arith.constant 1.000000e+00 : f32
    %10 = vector.broadcast %cst_7 : f32 to vector<8x128xf32>
    %11 = arith.addf %10, %9 : vector<8x128xf32>
    %12 = arith.divf %10, %11 : vector<8x128xf32>
    %13 = arith.subf %1, %0 : vector<8x128xf32>
    %14 = arith.mulf %12, %13 : vector<8x128xf32>
    %15 = arith.addf %0, %14 : vector<8x128xf32>
    %c0_8 = arith.constant 0 : index
    %c0_9 = arith.constant 0 : index
    %16 = vector.load %arg4[%c0_8, %c0_9] : memref<8x128xf32, #tpu.memory_space<vmem>>, vector<8x128xf32>
    tpu.vector_store %arg4[%c0_8, %c0_9], %15 {strides = array<i32>} : memref<8x128xf32, #tpu.memory_space<vmem>>, vector<8x128xf32>,
    return
  }
}

</mosaic_0001>

<bundles_post_ra>
// kernel: hsg_layer.1
= control target key start
LH: loop header
LB: loop body
LE: loop exit
PB: predicated region body
PF: predicated region fallthrough
CT: control target
= control target key end

     0   :  { %s348_s2 = inlined_call_operand.vmem [shape: f32[256,128], index: 2, kind: input, shape index: {}]   ;;  %s349_s0 = inlined_call_operand.vmem [shape: f32[8,128], index: 0, kind: input, shape index: {}]   ;;  %s350_s1 = inlined_call_operand.vmem [shape: f32[8,128], index: 1, kind: input, shape index: {}, may-alias: {1,4}]   ;;  %s351_s3 = inlined_call_operand.vmem [shape: f32[1,128], index: 3, kind: input, shape index: {}]   ;;  %s352_s4 = inlined_call_operand.vmem [shape: f32[8,128], index: 4, kind: output, shape index: {}, may-alias: {1,4}]  }
   0x1   :  { %v35_v0 = vld [vmem:[%s348_s2 + $0x80] sm:$0xff]  ;;  %v36_v1 = vld [vmem:[%s348_s2 + $0x88] sm:$0xff]  ;;  %v37_v5 = vld [vmem:[%s348_s2 + $0x90] sm:$0xff] }
   0x2   :  { %v19_v2 = vld [vmem:[%s348_s2] sm:$0xff]  ;;  %v179_v3 = vpack.c.bf16 %v36_v1, %v35_v0  ;;  %v20_v4 = vld [vmem:[%s348_s2 + $0x8] sm:$0xff]  ;;  %v38_v6 = vld [vmem:[%s348_s2 + $0x98] sm:$0xff] }
   0x3   :  { %v181_v7 = vpack.c.bf16 %v20_v4, %v19_v2  ;;  %v183_v8 = vpack.c.bf16 %v38_v6, %v37_v5  ;;  %v21_v9 = vld [vmem:[%s348_s2 + $0x10] sm:$0xff]  ;;  %v22_v10 = vld [vmem:[%s348_s2 + $0x18] sm:$0xff]  ;;  %v39_v11 = vld [vmem:[%s348_s2 + $0xa0] sm:$0xff] }
   0x4   :  { %180 = vmatprep.subr.bf16.mxu0 %v179_v3  ;;  %v40_v12 = vld [vmem:[%s348_s2 + $0xa8] sm:$0xff]  ;;  %v185_v13 = vpack.c.bf16 %v22_v10, %v21_v9  ;;  %v23_v15 = vld [vmem:[%s348_s2 + $0x20] sm:$0xff]  ;;  %v41_v17 = vld [vmem:[%s348_s2 + $0xb0] sm:$0xff] }
   0x5   :  { %182 = vmatpush3.bf16.msra.mxu0 %v181_v7  ;;  %v187_v14 = vpack.c.bf16 %v40_v12, %v39_v11  ;;  %v24_v16 = vld [vmem:[%s348_s2 + $0x28] sm:$0xff]  ;;  %v42_v18 = vld [vmem:[%s348_s2 + $0xb8] sm:$0xff]  ;;  %v25_v21 = vld [vmem:[%s348_s2 + $0x30] sm:$0xff] }
   0x6   :  { %184 = vmatprep.subr.bf16.mxu0 %v183_v8  ;;  %v189_v19 = vpack.c.bf16 %v24_v16, %v23_v15  ;;  %v191_v20 = vpack.c.bf16 %v42_v18, %v41_v17  ;;  %v26_v22 = vld [vmem:[%s348_s2 + $0x38] sm:$0xff]  ;;  %v43_v23 = vld [vmem:[%s348_s2 + $0xc0] sm:$0xff]  ;;  %v44_v24 = vld [vmem:[%s348_s2 + $0xc8] sm:$0xff] }
   0x7   :  { %v17_v25 = vld [vmem:[%s349_s0] sm:$0xff]  ;;  %v193_v26 = vpack.c.bf16 %v26_v22, %v25_v21  ;;  %v195_v27 = vpack.c.bf16 %v44_v24, %v43_v23  ;;  %v28_v29 = vld [vmem:[%s348_s2 + $0x48] sm:$0xff]  ;;  %v45_v30 = vld [vmem:[%s348_s2 + $0xd0] sm:$0xff] }
   0x8   :  { %122 = vmatprep.mubr.f32.mxu0 %v17_v25  ;;  %v27_v28 = vld [vmem:[%s348_s2 + $0x40] sm:$0xff]  ;;  %v46_v31 = vld [vmem:[%s348_s2 + $0xd8] sm:$0xff]  ;;  %v29_v34 = vld [vmem:[%s348_s2 + $0x50] sm:$0xff] }
   0x9   :  { %186 = vmatpush3.bf16.msra.mxu0 %v185_v13  ;;  %v197_v32 = vpack.c.bf16 %v28_v29, %v27_v28  ;;  %v199_v33 = vpack.c.bf16 %v46_v31, %v45_v30  ;;  %v30_v35 = vld [vmem:[%s348_s2 + $0x58] sm:$0xff]  ;;  %v47_v36 = vld [vmem:[%s348_s2 + $0xe0] sm:$0xff]  ;;  %v48_v37 = vld [vmem:[%s348_s2 + $0xe8] sm:$0xff] }
   0xa   :  { %188 = vmatprep.subr.bf16.mxu0 %v187_v14  ;;  %v201_v38 = vpack.c.bf16 %v30_v35, %v29_v34  ;;  %v203_v39 = vpack.c.bf16 %v48_v37, %v47_v36  ;;  %v31_v40 = vld [vmem:[%s348_s2 + $0x60] sm:$0xff]  ;;  %v32_v41 = vld [vmem:[%s348_s2 + $0x68] sm:$0xff]  ;;  %v49_v42 = vld [vmem:[%s348_s2 + $0xf0] sm:$0xff] }
   0xb   :  { %v50_v43 = vld [vmem:[%s348_s2 + $0xf8] sm:$0xff]  ;;  %v205_v44 = vpack.c.bf16 %v32_v41, %v31_v40  ;;  %v33_v46 = vld [vmem:[%s348_s2 + $0x70] sm:$0xff]  ;;  %v18_v49 = vld [vmem:[%s350_s1] sm:$0xff] }
   0xc   :  { %v207_v45 = vpack.c.bf16 %v50_v43, %v49_v42  ;;  %v34_v47 = vld [vmem:[%s348_s2 + $0x78] sm:$0xff]  ;;  %v142_v51 = vld [vmem:[%s351_s3] ss:$0 sm:$0xff]  ;;  %v134_v58 = vsub.f32 %v18_v49, %v17_v25 }
   0xd   :  { %190 = vmatpush3.bf16.msra.mxu0 %v189_v19  ;;  %v209_v48 = vpack.c.bf16 %v34_v47, %v33_v46 }
   0xe   :  { %192 = vmatprep.subr.bf16.mxu0 %v191_v20 }
  0x11   :  { %194 = vmatpush3.bf16.msra.mxu0 %v193_v26 }
  0x12   :  { %196 = vmatprep.subr.bf16.mxu0 %v195_v27 }
  0x15   :  { %198 = vmatpush3.bf16.msra.mxu0 %v197_v32 }
  0x16   :  { %200 = vmatprep.subr.bf16.mxu0 %v199_v33 }
  0x19   :  { %202 = vmatpush3.bf16.msra.mxu0 %v201_v38 }
  0x1a   :  { %204 = vmatprep.subr.bf16.mxu0 %v203_v39 }
  0x1d   :  { %206 = vmatpush3.bf16.msra.mxu0 %v205_v44 }
  0x1e   :  { %208 = vmatprep.subr.bf16.mxu0 %v207_v45 }
  0x21   :  { %210 = vmatpush3.bf16.msra.mxu0 %v209_v48 }
  0x24   :  { %123 = vmatmul.mubr.f32.vlgmr.msra.gmra.mrb[0].mxu0 %v18_v49 }
  0xf7   :  { %v176_v50 = vpop.f32.mrb[0].mxu0 }
  0xf8   :  { %v177_v52 = vpop.f32.mrb[1].mxu0 }
  0xf9   :  { %v178_v53 = vadd.f32 %v177_v52, %v176_v50 }
  0xfb   :  { %v125_v54 = vadd.f32 %v178_v53, %v142_v51 }
  0xfd   :  { %v143_v55 = vmul.f32 -1.442695, %v125_v54 }
  0xff   :  { %211 = vpow2.f32 %v143_v55 }
 0x109   :  { %v212_v56 = vpop.eup %211 }
 0x10a   :  { %v131_v57 = vadd.f32 1.0, %v212_v56 }
 0x10c   :  { %213 = vrcp.f32 %v131_v57 }
 0x116   :  { %v214_v59 = vpop.eup %213 }
 0x117   :  { %v135_v60 = vmul.f32 %v214_v59, %v134_v58 }
 0x119   :  { %v136_v61 = vadd.f32 %v135_v60, %v17_v25 }
 0x11b   :  { %137 = vst [vmem:[%s352_s4] sm:$0xff] %v136_v61 }

</bundles_post_ra>
